<compile_context>
chip_gen: v5e
topology: v5e:2x2
jax: 0.10.0
libtpu: 0.0.40
codegen_flags: <defaults>
</compile_context>

<pallas_src>
import jax
import jax.numpy as jnp
import numpy as np
from jax.experimental import pallas as pl
from jax.experimental.pallas import tpu as pltpu


def _blur_kernel(x_ref, o_ref, buf_ref):
    # x_ref:   (TM, L)     rows = flattened (n, c), lanes = L
    # o_ref:   (TM, L)
    # buf_ref: (TM, L + 2) f32 VMEM scratch; columns 0 and L+1 are the zero halo
    tm, L = x_ref.shape
    x = x_ref[...].astype(jnp.float32)

    zero_col = jnp.zeros((tm, 1), jnp.float32)
    buf_ref[:, 0:1] = zero_col                 # left zero-pad column  (padding=1)
    buf_ref[:, L + 1:L + 2] = zero_col         # right zero-pad column (padding=1)
    buf_ref[:, 1:L + 1] = x                    # body at lane offset 1

    left = buf_ref[:, 0:L]                     # x[:, j-1], zero at j == 0
    right = buf_ref[:, 2:L + 2]                # x[:, j+1], zero at j == L-1
    # Hardcoded [1, 2, 1] / 4 taps (identical for every channel in the module).
    o_ref[...] = (0.25 * (left + right) + 0.5 * x).astype(o_ref.dtype)


def _round_up(v, m):
    return (v + m - 1) // m * m


def _choose_row_tile(rows, L, itemsize):
    """Rows per block: multiple of 8, ~2 MiB per block (comfortably under the v7x 64 MiB
    VMEM with double buffering), and >=2 grid steps when there is enough work so a
    dual-TensorCore chip keeps both cores busy."""
    lane_bytes = max(L, 128) * itemsize        # lane dim pads up to 128 in VMEM
    target_block_bytes = 2 * 1024 * 1024
    tm = max(8, min((target_block_bytes // lane_bytes) // 8 * 8, 1024))
    if rows <= 8:
        return int(rows)                       # block == full dim is always legal
    if tm >= rows:
        tm = max(8, _round_up(-(-rows // 2), 8))   # split into >= 2 blocks
    return int(tm)


def blur_pallas(x):
    """Depthwise blur along the last axis of x:(N, C, L).
    Matches F.conv1d(x, per-channel [1,2,1]/4 taps, padding=1, groups=C)."""
    N, C, L = x.shape
    R = N * C
    x2 = x.reshape(R, L)                       # free: NCL is contiguous
    tm = _choose_row_tile(R, L, jnp.dtype(x.dtype).itemsize)
    grid = (pl.cdiv(R, tm),)

    out = pl.pallas_call(
        _blur_kernel,
        out_shape=jax.ShapeDtypeStruct((R, L), x.dtype),
        grid_spec=pltpu.PrefetchScalarGridSpec(
            num_scalar_prefetch=0,
            grid=grid,
            in_specs=[pl.BlockSpec((tm, L), lambda r: (r, 0))],
            out_specs=pl.BlockSpec((tm, L), lambda r: (r, 0)),
            scratch_shapes=[pltpu.VMEM((tm, L + 2), jnp.float32)],
        ),
        compiler_params=pltpu.CompilerParams(
            dimension_semantics=("parallel",),
            vmem_limit_bytes=48 * 1024 * 1024,  # safe on v7x (64 MiB physical), ample on v5e/v6e
        ),
    )(x2)
    return out.reshape(N, C, L)


def blur_reference(x):
    # Pure-JAX reference of F.conv1d(x, [1,2,1]/4 depthwise, padding=1, groups=C)
    xpad = jnp.pad(x.astype(jnp.float32), ((0, 0), (0, 0), (1, 1)))
    out = 0.25 * (xpad[:, :, :-2] + xpad[:, :, 2:]) + 0.5 * xpad[:, :, 1:-1]
    return out.astype(x.dtype)


if __name__ == "__main__":
    key = jax.random.PRNGKey(0)

    # Primary small shape implied by the module's Blur usage: (N, C, L)
    N, C, L = 2, 4, 16
    x = jax.random.normal(key, (N, C, L), dtype=jnp.float32)
    out = blur_pallas(x)
    jax.block_until_ready(out)
    np.testing.assert_allclose(np.asarray(out), np.asarray(blur_reference(x)),
                               rtol=1e-6, atol=1e-6)

    # Edge / multi-block checks: >1 grid step, masked trailing row block, and the
    # in-kernel zero halo at columns 0 and L-1.
    for shape in [(2, 16, 128), (3, 5, 64)]:
        key, sub = jax.random.split(key)
        xt = jax.random.normal(sub, shape, dtype=jnp.float32)
        ot = blur_pallas(xt)
        jax.block_until_ready(ot)
        np.testing.assert_allclose(np.asarray(ot), np.asarray(blur_reference(xt)),
                                   rtol=1e-6, atol=1e-6)

    print("KERNEL_OK")
</pallas_src>

<mosaic_0001>
module attributes {stable_mosaic.version = 11 : i64} {
  func.func @_blur_kernel(%arg0: i32, %arg1: memref<8x16xf32, #tpu.memory_space<vmem>>, %arg2: memref<8x16xf32, #tpu.memory_space<vmem>>, %arg3: memref<8x18xf32, #tpu.memory_space<vmem>>) attributes {dimension_semantics = [#tpu.dimension_semantics<parallel>], iteration_bounds = array<i64: 1>, scalar_prefetch = 0 : i64, scratch_operands = 1 : i64, tpu.core_type = #tpu.core_type<tc>, window_params = [{transform_indices = @transform_0, window_bounds = array<i64: 8, 16>}, {transform_indices = @transform_1, window_bounds = array<i64: 8, 16>}]} {
    %c0 = arith.constant 0 : index
    %c0_0 = arith.constant 0 : index
    %0 = vector.load %arg1[%c0, %c0_0] : memref<8x16xf32, #tpu.memory_space<vmem>>, vector<8x16xf32>
    %cst = arith.constant 0.000000e+00 : f32
    %1 = vector.broadcast %cst : f32 to vector<8x1xf32>
    %c0_1 = arith.constant 0 : index
    %c0_2 = arith.constant 0 : index
    %2 = vector.load %arg3[%c0_1, %c0_2] : memref<8x18xf32, #tpu.memory_space<vmem>>, vector<8x1xf32>
    tpu.vector_store %arg3[%c0_1, %c0_2], %1 {strides = array<i32>} : memref<8x18xf32, #tpu.memory_space<vmem>>, vector<8x1xf32>,
    %c0_3 = arith.constant 0 : index
    %c17 = arith.constant 17 : index
    %3 = vector.load %arg3[%c0_3, %c17] : memref<8x18xf32, #tpu.memory_space<vmem>>, vector<8x1xf32>
    tpu.vector_store %arg3[%c0_3, %c17], %1 {strides = array<i32>} : memref<8x18xf32, #tpu.memory_space<vmem>>, vector<8x1xf32>,
    %c0_4 = arith.constant 0 : index
    %c1 = arith.constant 1 : index
    %4 = vector.load %arg3[%c0_4, %c1] : memref<8x18xf32, #tpu.memory_space<vmem>>, vector<8x16xf32>
    tpu.vector_store %arg3[%c0_4, %c1], %0 {strides = array<i32>} : memref<8x18xf32, #tpu.memory_space<vmem>>, vector<8x16xf32>,
    %c0_5 = arith.constant 0 : index
    %c0_6 = arith.constant 0 : index
    %5 = vector.load %arg3[%c0_5, %c0_6] : memref<8x18xf32, #tpu.memory_space<vmem>>, vector<8x16xf32>
    %c0_7 = arith.constant 0 : index
    %c2 = arith.constant 2 : index
    %6 = vector.load %arg3[%c0_7, %c2] : memref<8x18xf32, #tpu.memory_space<vmem>>, vector<8x16xf32>
    %7 = arith.addf %5, %6 : vector<8x16xf32>
    %cst_8 = arith.constant 2.500000e-01 : f32
    %8 = vector.broadcast %cst_8 : f32 to vector<8x16xf32>
    %9 = arith.mulf %8, %7 : vector<8x16xf32>
    %cst_9 = arith.constant 5.000000e-01 : f32
    %10 = vector.broadcast %cst_9 : f32 to vector<8x16xf32>
    %11 = arith.mulf %10, %0 : vector<8x16xf32>
    %12 = arith.addf %9, %11 : vector<8x16xf32>
    %c0_10 = arith.constant 0 : index
    %c0_11 = arith.constant 0 : index
    %13 = vector.load %arg2[%c0_10, %c0_11] : memref<8x16xf32, #tpu.memory_space<vmem>>, vector<8x16xf32>
    tpu.vector_store %arg2[%c0_10, %c0_11], %12 {strides = array<i32>} : memref<8x16xf32, #tpu.memory_space<vmem>>, vector<8x16xf32>,
    return
  }
  func.func @transform_0(%arg0: i32) -> (i32, i32) {
    %c0_i32 = arith.constant 0 : i32
    %c0_i32_0 = arith.constant 0 : i32
    return %arg0, %c0_i32 : i32, i32
  }
  func.func @transform_1(%arg0: i32) -> (i32, i32) {
    %c0_i32 = arith.constant 0 : i32
    %c0_i32_0 = arith.constant 0 : i32
    return %arg0, %c0_i32 : i32, i32
  }
}

</mosaic_0001>

<bundles_post_ra>
// kernel: tpu_custom_call.1
= control target key start
LH: loop header
LB: loop body
LE: loop exit
PB: predicated region body
PF: predicated region fallthrough
CT: control target
= control target key end

     0   :  { %6 = vsyncpa [#allocation4], 0  ;;  %s140_s0 = inlined_call_operand.hbm [shape: f32[8,16], index: 0, kind: input, shape index: {}]   ;;  %s141_s1 = inlined_call_operand.hbm [shape: f32[8,16], index: 1, kind: output, shape index: {}]  }
   0x1   :  { %7 = vsyncpa [#allocation5], 0  ;;  %s13_s8 = sshll.u32 %s140_s0, 4  ;;  %s119_s9 = smov [#allocation3]   ;;  %s14_s8 = int_to_ptr.hbm [resolvable:$true] %s13_s8 }
   0x2   :  { %s15_s10 = sshll.u32 %s119_s9, 4  ;;  %s16_s10 = int_to_ptr.vmem [resolvable:$true] %s15_s10 }
   0x3   :  { %18 = dma.hbm_to_vmem [thread:$0]  %s14_s8, 128, %s16_s10, [#allocation4]  }
   0x4   :  { %115 = dma.done.wait [#allocation4], 128  }
   0x5   :  { %116 = vsyncadd [#allocation4], 4294967168  ;;  %vm24_vm0 = vcmask 7168   ;;  %vm26_vm1 = vcmask 146568   ;;  %v120_v0 = vmov 0.0   ;;  %v23_v1 = vld [vmem:[#allocation3] sm:$0xff] }
   0x6   :  { %25 = vst.msk [vmem:[#allocation2] sm:$0xff] %vm24_vm0, %v120_v0  ;;  %s121_s11 = smov 1   ;;  %vm32_vm2 = vcmask 138248   ;;  %s122_s0 = smov 126   ;;  %v41_v5 = vmul.f32 0.5, %v23_v1  ;;  %vm43_vm3 = vcmask 130048  }
   0x7   :  { %27 = vst.msk [vmem:[#allocation2] sm:$0xff] %vm26_vm1, %v120_v0  ;;  %29 = vrot.lane.b32.xlu0 %v23_v1, %s121_s11  ;;  %s123_s12 = smov [#allocation6]   ;;  %s52_s16 = sshll.u32 %s141_s1, 4  ;;  %s53_s16 = int_to_ptr.hbm [resolvable:$true] %s52_s16 }
   0x8   :  { %s50_s13 = sshll.u32 %s123_s12, 4  ;;  %s51_s13 = int_to_ptr.vmem [resolvable:$true] %s50_s13 }
  0x79   :  { %v30_v2 = vpop.permute.xlu0 %29 }
  0x7a   :  { %33 = vst.msk [vmem:[#allocation2] sm:$0xff] %vm32_vm2, %v30_v2 }
  0x81   :  { %v34_v3 = vld [vmem:[#allocation2] sm:$0xff] }
  0x82   :  { %36 = vrot.lane.b32.xlu0 %v34_v3, %s122_s0 }
  0xf4   :  { %v37_v4 = vpop.permute.xlu0 %36 }
  0xf5   :  { %v39_v6 = vadd.f32 %v37_v4, %v34_v3 }
  0xf7   :  { %v40_v7 = vmul.f32 0.25, %v39_v6 }
  0xf9   :  { %v42_v8 = vadd.f32 %v41_v5, %v40_v7 }
  0xfb   :  { %44 = vst.msk [vmem:[#allocation6] sm:$0xff] %vm43_vm3, %v42_v8 }
  0xfc   :  { %55 = dma.vmem_to_hbm [thread:$0]  %s51_s13, 128, %s53_s16, [#allocation5]  }
  0xfd   :  { %117 = dma.done.wait [#allocation5], 128  }
  0xfe   :  { %118 = vsyncadd [#allocation5], 4294967168 }
  0xff   :  { %60 = vsyncpa [#allocation4], 1 }
 0x100   :  { %61 = vsyncpa [#allocation5], 1 }

</bundles_post_ra>
